<compile_context>
chip_gen: v5e
topology: v5e:2x2
jax: 0.10.0
libtpu: 0.0.40
codegen_flags: <defaults>
</compile_context>

<pallas_src>
import functools

import jax
import jax.numpy as jnp
from jax import lax
from jax.experimental import pallas as pl
from jax.experimental.pallas import tpu as pltpu


def _elu(x):
    # F.elu(alpha=1.0). Clamp the exp argument so the discarded branch never
    # evaluates exp on large positive x.
    return jnp.where(x > 0, x, jnp.exp(jnp.minimum(x, 0.0)) - 1.0)


def _decoder_kernel(xt_ref,
                    w1_ref, b1_ref,
                    w2_ref, b2_ref,
                    w3_ref, b3_ref,
                    w4_ref, b4_ref,
                    o_ref, *, chunk):
    # Resident (constant index_map) operands: loaded once per grid step.
    w1 = w1_ref[...]            # (h1, in_pad) bf16
    w2 = w2_ref[...]            # (h2, h1)     bf16
    w3 = w3_ref[...]            # (h3, h2)     bf16
    w4 = w4_ref[...]            # (h3, 1)      f32  (VPU path, keep f32 for v5e)
    b1 = b1_ref[...]            # (h1, 1)      f32
    b2 = b2_ref[...]            # (h2, 1)      f32
    b3 = b3_ref[...]            # (h3, 1)      f32
    b4 = b4_ref[...]            # (1, 1)       f32

    n_chunks = xt_ref.shape[1] // chunk

    def body(c, carry):
        start = pl.multiple_of(c * chunk, chunk)
        xt = xt_ref[:, pl.ds(start, chunk)]                 # (in_pad, chunk) bf16

        # bf16 operands, f32 accumulation -> single MXU pass per layer.
        h = jnp.dot(w1, xt, preferred_element_type=jnp.float32) + b1
        h = _elu(h)
        h = jnp.dot(w2, h.astype(jnp.bfloat16),
                    preferred_element_type=jnp.float32) + b2
        h = _elu(h)
        h = jnp.dot(w3, h.astype(jnp.bfloat16),
                    preferred_element_type=jnp.float32) + b3
        h = _elu(h)

        # Final layer (out_dim=1): VPU broadcast-multiply + sublane reduce (XLU)
        # instead of an N=1 MXU matmul; result is lane-dense (1, chunk).
        y = jnp.sum(h * w4, axis=0, keepdims=True) + b4

        # Tail-safe sigmoid in f32.
        o_ref[:, pl.ds(start, chunk)] = (
            1.0 / (1.0 + jnp.exp(-y))).astype(o_ref.dtype)
        return carry

    lax.fori_loop(0, n_chunks, body, None, unroll=True)


def _round_up(n, m):
    return ((n + m - 1) // m) * m


def _pick_batch_tile(b_pad, block_b):
    """Largest multiple of 128 that divides b_pad, capped by block_b and by
    b_pad//2 (so the grid has >= 2 steps whenever B > 128: feeds both v7x
    TensorCores and enables input/output pipelining)."""
    n = b_pad // 128
    k_cap = max(1, min(block_b // 128, n))
    if n >= 2:
        k_cap = max(1, min(k_cap, n // 2))
    k = max(d for d in range(1, k_cap + 1) if n % d == 0)
    return 128 * k


@functools.partial(jax.jit, static_argnames=("block_b",))
def estimation_decoder_fc(x, params, *, block_b=1024):
    """Fused forward pass.

    x: (B, input_dim) float32.
    params: PyTorch-layout dict: w_i (out, in) f32, b_i (out,) f32.
    block_b: max batch tile (multiple of 128; sweep 512-2048 for huge batches).
    """
    B, in_dim = x.shape
    w1, b1 = params["w1"], params["b1"]
    w2, b2 = params["w2"], params["b2"]
    w3, b3 = params["w3"], params["b3"]
    w4, b4 = params["w4"], params["b4"]
    h1, h2, h3 = w1.shape[0], w2.shape[0], w3.shape[0]
    out_dim = w4.shape[0]
    assert out_dim == 1

    in_pad = _round_up(max(in_dim, 1), 8)       # 6 -> 8: clean sublane layout
    b_pad = _round_up(B, 128)                   # pad only to 128, never to bt
    bt = _pick_batch_tile(b_pad, block_b)
    chunk = 256 if bt % 256 == 0 else 128       # inner per-chunk live set <= ~16 vregs

    # One fused relayout: pad (batch, features), transpose to feature-major,
    # cast to bf16 (halves the per-step xt DMA).
    x_p = jnp.pad(x, ((0, b_pad - B), (0, in_pad - in_dim)))
    xt = x_p.T.astype(jnp.bfloat16)             # (in_pad, b_pad): batch on lanes

    # Weights for the MXU in bf16 (single-pass); biases / final weight stay f32.
    w1b = jnp.pad(w1, ((0, 0), (0, in_pad - in_dim))).astype(jnp.bfloat16)
    w2b = w2.astype(jnp.bfloat16)
    w3b = w3.astype(jnp.bfloat16)
    b1c = b1.reshape(h1, 1)
    b2c = b2.reshape(h2, 1)
    b3c = b3.reshape(h3, 1)
    w4c = w4.reshape(h3, 1)                     # (1, h3) -> (h3, 1) column
    b4c = b4.reshape(1, 1)

    grid = (b_pad // bt,)

    def const(arr):
        # Resident operand: same block every grid step -> DMA'd once.
        return pl.BlockSpec(arr.shape, lambda i: (0, 0))

    flops = 2 * b_pad * (in_pad * h1 + h1 * h2 + h2 * h3 + h3 * out_dim)
    transcendentals = b_pad * (h1 + h2 + h3 + out_dim)
    param_bytes = (sum(int(a.size) * 2 for a in (w1b, w2b, w3b))
                   + sum(int(a.size) * 4 for a in (b1c, b2c, b3c, w4c, b4c)))
    bytes_accessed = 2 * b_pad * in_pad + 4 * b_pad * out_dim + param_bytes

    out = pl.pallas_call(
        functools.partial(_decoder_kernel, chunk=chunk),
        out_shape=jax.ShapeDtypeStruct((1, b_pad), x.dtype),
        grid=grid,
        in_specs=[
            pl.BlockSpec((in_pad, bt), lambda i: (0, i)),   # x^T: tiled over batch
            const(w1b), const(b1c),
            const(w2b), const(b2c),
            const(w3b), const(b3c),
            const(w4c), const(b4c),
        ],
        out_specs=pl.BlockSpec((1, bt), lambda i: (0, i)),  # lane-dense output row
        compiler_params=pltpu.CompilerParams(
            dimension_semantics=("parallel",),              # megacore over batch
        ),
        cost_estimate=pl.CostEstimate(
            flops=flops,
            transcendentals=transcendentals,
            bytes_accessed=bytes_accessed,
        ),
    )(xt, w1b, b1c, w2b, b2c, w3b, b3c, w4c, b4c)

    return out[0, :B].reshape(B, 1)


def init_params(key, input_dim=6, nodes=(64, 64, 32), output_dim=1):
    """Deterministic init mirroring nn.Linear's U(-1/sqrt(fan_in), 1/sqrt(fan_in)).

    Weights stored in PyTorch layout: w_i (out, in), b_i (out,)."""
    dims = [input_dim, nodes[0], nodes[1], nodes[2], output_dim]
    params = {}
    keys = jax.random.split(key, 8)
    for i in range(4):
        fan_in = dims[i]
        bound = 1.0 / float(fan_in) ** 0.5
        w = jax.random.uniform(keys[2 * i], (dims[i + 1], dims[i]),
                               minval=-bound, maxval=bound, dtype=jnp.float32)
        b = jax.random.uniform(keys[2 * i + 1], (dims[i + 1],),
                               minval=-bound, maxval=bound, dtype=jnp.float32)
        params[f"w{i + 1}"] = w
        params[f"b{i + 1}"] = b
    return params


def reference_forward(x, params):
    """Plain-JAX f32 reference of the PyTorch forward (dropout p=0 is identity)."""
    h = x
    for i in (1, 2, 3):
        h = h @ params[f"w{i}"].T + params[f"b{i}"]
        h = jnp.where(h > 0, h, jnp.exp(jnp.minimum(h, 0.0)) - 1.0)
    h = h @ params["w4"].T + params["b4"]
    return 1.0 / (1.0 + jnp.exp(-h))


if __name__ == "__main__":
    key = jax.random.PRNGKey(0)
    k_x, k_p, k_x2, k_x3 = jax.random.split(key, 4)

    input_dim = 6
    params = init_params(k_p, input_dim=input_dim)

    # bf16 MXU operands -> compare against the f32 reference at a looser tolerance.
    TOL = dict(atol=2e-2, rtol=2e-2)

    # Primary small shape: B=8 (single 128-wide tile, grid=1).
    x = jax.random.normal(k_x, (8, input_dim), dtype=jnp.float32)
    out = jax.block_until_ready(estimation_decoder_fc(x, params))
    ref = reference_forward(x, params)
    assert out.shape == (8, 1)
    assert jnp.allclose(out, ref, **TOL), "mismatch vs reference (B=8)"

    # Tight-padding / multi-step grid path: B=260 -> pad to 384, bt=128, grid=3.
    x2 = jax.random.normal(k_x2, (260, input_dim), dtype=jnp.float32)
    out2 = jax.block_until_ready(estimation_decoder_fc(x2, params))
    ref2 = reference_forward(x2, params)
    assert out2.shape == (260, 1)
    assert jnp.allclose(out2, ref2, **TOL), "mismatch vs reference (B=260)"

    # 256-lane inner-chunk path with grid >= 2: B=512 -> bt=256, chunk=256, grid=2.
    x3 = jax.random.normal(k_x3, (512, input_dim), dtype=jnp.float32)
    out3 = jax.block_until_ready(estimation_decoder_fc(x3, params))
    ref3 = reference_forward(x3, params)
    assert out3.shape == (512, 1)
    assert jnp.allclose(out3, ref3, **TOL), "mismatch vs reference (B=512)"

    print("KERNEL_OK")
</pallas_src>

<mosaic_0001>
module attributes {stable_mosaic.version = 11 : i64} {
  func.func @_decoder_kernel(%arg0: i32, %arg1: memref<8x128xbf16, #tpu.memory_space<vmem>>, %arg2: memref<64x8xbf16, #tpu.memory_space<vmem>>, %arg3: memref<64x1xf32, #tpu.memory_space<vmem>>, %arg4: memref<64x64xbf16, #tpu.memory_space<vmem>>, %arg5: memref<64x1xf32, #tpu.memory_space<vmem>>, %arg6: memref<32x64xbf16, #tpu.memory_space<vmem>>, %arg7: memref<32x1xf32, #tpu.memory_space<vmem>>, %arg8: memref<32x1xf32, #tpu.memory_space<vmem>>, %arg9: memref<1x1xf32, #tpu.memory_space<vmem>>, %arg10: memref<1x128xf32, #tpu.memory_space<vmem>>) attributes {dimension_semantics = [#tpu.dimension_semantics<parallel>], iteration_bounds = array<i64: 1>, scalar_prefetch = 0 : i64, scratch_operands = 0 : i64, tpu.core_type = #tpu.core_type<tc>, window_params = [{transform_indices = @transform_0, window_bounds = array<i64: 8, 128>}, {pipeline_mode = #tpu.pipeline_mode<synchronous>, transform_indices = @transform_1, window_bounds = array<i64: 64, 8>}, {pipeline_mode = #tpu.pipeline_mode<synchronous>, transform_indices = @transform_2, window_bounds = array<i64: 64, 1>}, {pipeline_mode = #tpu.pipeline_mode<synchronous>, transform_indices = @transform_3, window_bounds = array<i64: 64, 64>}, {pipeline_mode = #tpu.pipeline_mode<synchronous>, transform_indices = @transform_4, window_bounds = array<i64: 64, 1>}, {pipeline_mode = #tpu.pipeline_mode<synchronous>, transform_indices = @transform_5, window_bounds = array<i64: 32, 64>}, {pipeline_mode = #tpu.pipeline_mode<synchronous>, transform_indices = @transform_6, window_bounds = array<i64: 32, 1>}, {pipeline_mode = #tpu.pipeline_mode<synchronous>, transform_indices = @transform_7, window_bounds = array<i64: 32, 1>}, {pipeline_mode = #tpu.pipeline_mode<synchronous>, transform_indices = @transform_8, window_bounds = array<i64: 1, 1>}, {transform_indices = @transform_9, window_bounds = array<i64: 1, 128>}]} {
    %c0 = arith.constant 0 : index
    %c0_0 = arith.constant 0 : index
    %0 = vector.load %arg2[%c0, %c0_0] : memref<64x8xbf16, #tpu.memory_space<vmem>>, vector<64x8xbf16>
    %c0_1 = arith.constant 0 : index
    %c0_2 = arith.constant 0 : index
    %1 = vector.load %arg4[%c0_1, %c0_2] : memref<64x64xbf16, #tpu.memory_space<vmem>>, vector<64x64xbf16>
    %c0_3 = arith.constant 0 : index
    %c0_4 = arith.constant 0 : index
    %2 = vector.load %arg6[%c0_3, %c0_4] : memref<32x64xbf16, #tpu.memory_space<vmem>>, vector<32x64xbf16>
    %c0_5 = arith.constant 0 : index
    %c0_6 = arith.constant 0 : index
    %3 = vector.load %arg8[%c0_5, %c0_6] : memref<32x1xf32, #tpu.memory_space<vmem>>, vector<32x1xf32>
    %c0_7 = arith.constant 0 : index
    %c0_8 = arith.constant 0 : index
    %4 = vector.load %arg3[%c0_7, %c0_8] : memref<64x1xf32, #tpu.memory_space<vmem>>, vector<64x1xf32>
    %c0_9 = arith.constant 0 : index
    %c0_10 = arith.constant 0 : index
    %5 = vector.load %arg5[%c0_9, %c0_10] : memref<64x1xf32, #tpu.memory_space<vmem>>, vector<64x1xf32>
    %c0_11 = arith.constant 0 : index
    %c0_12 = arith.constant 0 : index
    %6 = vector.load %arg7[%c0_11, %c0_12] : memref<32x1xf32, #tpu.memory_space<vmem>>, vector<32x1xf32>
    %c0_13 = arith.constant 0 : index
    %c0_14 = arith.constant 0 : index
    %7 = vector.load %arg9[%c0_13, %c0_14] : memref<1x1xf32, #tpu.memory_space<vmem>>, vector<1x1xf32>
    %c0_i32 = arith.constant 0 : i32
    %c128_i32 = arith.constant 128 : i32
    %8 = arith.muli %c0_i32, %c128_i32 : i32
    %9 = tpu.assume_multiple %8, 128 : i32
    %c0_15 = arith.constant 0 : index
    %10 = arith.index_cast %9 : i32 to index
    %11 = vector.load %arg1[%c0_15, %10] : memref<8x128xbf16, #tpu.memory_space<vmem>>, vector<8x128xbf16>
    %cst = arith.constant dense<0.000000e+00> : vector<64x128xf32>
    %12 = tpu.matmul %0, %11, %cst {dimension_numbers = #tpu.dot_dimension_numbers<[1], [0], [0], [1], [0, 0, 1, 1], [], []>} : vector<64x8xbf16>, vector<8x128xbf16>, vector<64x128xf32> -> vector<64x128xf32>
    %13 = vector.broadcast %4 : vector<64x1xf32> to vector<64x128xf32>
    %14 = arith.addf %12, %13 : vector<64x128xf32>
    %cst_16 = arith.constant 0.000000e+00 : f32
    %15 = vector.broadcast %cst_16 : f32 to vector<64x128xf32>
    %16 = arith.cmpf ogt, %14, %15 : vector<64x128xf32>
    %cst_17 = arith.constant 0.000000e+00 : f32
    %17 = vector.broadcast %cst_17 : f32 to vector<64x128xf32>
    %18 = arith.minimumf %14, %17 : vector<64x128xf32>
    %19 = math.exp %18 : vector<64x128xf32>
    %cst_18 = arith.constant 1.000000e+00 : f32
    %20 = vector.broadcast %cst_18 : f32 to vector<64x128xf32>
    %21 = arith.subf %19, %20 : vector<64x128xf32>
    %22 = arith.select %16, %14, %21 : vector<64x128xi1>, vector<64x128xf32>
    %23 = arith.truncf %22 : vector<64x128xf32> to vector<64x128xbf16>
    %cst_19 = arith.constant dense<0.000000e+00> : vector<64x128xf32>
    %24 = tpu.matmul %1, %23, %cst_19 {dimension_numbers = #tpu.dot_dimension_numbers<[1], [0], [0], [1], [0, 0, 1, 1], [], []>} : vector<64x64xbf16>, vector<64x128xbf16>, vector<64x128xf32> -> vector<64x128xf32>
    %25 = vector.broadcast %5 : vector<64x1xf32> to vector<64x128xf32>
    %26 = arith.addf %24, %25 : vector<64x128xf32>
    %cst_20 = arith.constant 0.000000e+00 : f32
    %27 = vector.broadcast %cst_20 : f32 to vector<64x128xf32>
    %28 = arith.cmpf ogt, %26, %27 : vector<64x128xf32>
    %cst_21 = arith.constant 0.000000e+00 : f32
    %29 = vector.broadcast %cst_21 : f32 to vector<64x128xf32>
    %30 = arith.minimumf %26, %29 : vector<64x128xf32>
    %31 = math.exp %30 : vector<64x128xf32>
    %cst_22 = arith.constant 1.000000e+00 : f32
    %32 = vector.broadcast %cst_22 : f32 to vector<64x128xf32>
    %33 = arith.subf %31, %32 : vector<64x128xf32>
    %34 = arith.select %28, %26, %33 : vector<64x128xi1>, vector<64x128xf32>
    %35 = arith.truncf %34 : vector<64x128xf32> to vector<64x128xbf16>
    %cst_23 = arith.constant dense<0.000000e+00> : vector<32x128xf32>
    %36 = tpu.matmul %2, %35, %cst_23 {dimension_numbers = #tpu.dot_dimension_numbers<[1], [0], [0], [1], [0, 0, 1, 1], [], []>} : vector<32x64xbf16>, vector<64x128xbf16>, vector<32x128xf32> -> vector<32x128xf32>
    %37 = vector.broadcast %6 : vector<32x1xf32> to vector<32x128xf32>
    %38 = arith.addf %36, %37 : vector<32x128xf32>
    %cst_24 = arith.constant 0.000000e+00 : f32
    %39 = vector.broadcast %cst_24 : f32 to vector<32x128xf32>
    %40 = arith.cmpf ogt, %38, %39 : vector<32x128xf32>
    %cst_25 = arith.constant 0.000000e+00 : f32
    %41 = vector.broadcast %cst_25 : f32 to vector<32x128xf32>
    %42 = arith.minimumf %38, %41 : vector<32x128xf32>
    %43 = math.exp %42 : vector<32x128xf32>
    %cst_26 = arith.constant 1.000000e+00 : f32
    %44 = vector.broadcast %cst_26 : f32 to vector<32x128xf32>
    %45 = arith.subf %43, %44 : vector<32x128xf32>
    %46 = arith.select %40, %38, %45 : vector<32x128xi1>, vector<32x128xf32>
    %47 = vector.broadcast %3 : vector<32x1xf32> to vector<32x128xf32>
    %48 = arith.mulf %46, %47 : vector<32x128xf32>
    %cst_27 = arith.constant dense<0.000000e+00> : vector<128xf32>
    %49 = vector.multi_reduction <add>, %48, %cst_27 [0] : vector<32x128xf32> to vector<128xf32>
    %50 = vector.shape_cast %49 : vector<128xf32> to vector<1x128xf32>
    %51 = vector.broadcast %7 : vector<1x1xf32> to vector<1x128xf32>
    %52 = arith.addf %50, %51 : vector<1x128xf32>
    %cst_28 = arith.constant 0.000000e+00 : f32
    %53 = vector.broadcast %cst_28 : f32 to vector<1x128xf32>
    %54 = arith.subf %53, %52 : vector<1x128xf32>
    %55 = math.exp %54 : vector<1x128xf32>
    %cst_29 = arith.constant 1.000000e+00 : f32
    %56 = vector.broadcast %cst_29 : f32 to vector<1x128xf32>
    %57 = arith.addf %56, %55 : vector<1x128xf32>
    %cst_30 = arith.constant 1.000000e+00 : f32
    %58 = vector.broadcast %cst_30 : f32 to vector<1x128xf32>
    %59 = arith.divf %58, %57 : vector<1x128xf32>
    %c0_31 = arith.constant 0 : index
    %60 = arith.index_cast %9 : i32 to index
    %61 = vector.load %arg10[%c0_31, %60] : memref<1x128xf32, #tpu.memory_space<vmem>>, vector<1x128xf32>
    tpu.vector_store %arg10[%c0_31, %60], %59 {strides = array<i32>} : memref<1x128xf32, #tpu.memory_space<vmem>>, vector<1x128xf32>,
    %c1_i32 = arith.constant 1 : i32
    return
  }
  func.func @transform_0(%arg0: i32) -> (i32, i32) {
    %c0_i32 = arith.constant 0 : i32
    %c0_i32_0 = arith.constant 0 : i32
    return %c0_i32, %arg0 : i32, i32
  }
  func.func @transform_1(%arg0: i32) -> (i32, i32) {
    %c0_i32 = arith.constant 0 : i32
    %c0_i32_0 = arith.constant 0 : i32
    %c0_i32_1 = arith.constant 0 : i32
    return %c0_i32, %c0_i32_0 : i32, i32
  }
  func.func @transform_2(%arg0: i32) -> (i32, i32) {
    %c0_i32 = arith.constant 0 : i32
    %c0_i32_0 = arith.constant 0 : i32
    %c0_i32_1 = arith.constant 0 : i32
    return %c0_i32, %c0_i32_0 : i32, i32
  }
  func.func @transform_3(%arg0: i32) -> (i32, i32) {
    %c0_i32 = arith.constant 0 : i32
    %c0_i32_0 = arith.constant 0 : i32
    %c0_i32_1 = arith.constant 0 : i32
    return %c0_i32, %c0_i32_0 : i32, i32
  }
  func.func @transform_4(%arg0: i32) -> (i32, i32) {
    %c0_i32 = arith.constant 0 : i32
    %c0_i32_0 = arith.constant 0 : i32
    %c0_i32_1 = arith.constant 0 : i32
    return %c0_i32, %c0_i32_0 : i32, i32
  }
  func.func @transform_5(%arg0: i32) -> (i32, i32) {
    %c0_i32 = arith.constant 0 : i32
    %c0_i32_0 = arith.constant 0 : i32
    %c0_i32_1 = arith.constant 0 : i32
    return %c0_i32, %c0_i32_0 : i32, i32
  }
  func.func @transform_6(%arg0: i32) -> (i32, i32) {
    %c0_i32 = arith.constant 0 : i32
    %c0_i32_0 = arith.constant 0 : i32
    %c0_i32_1 = arith.constant 0 : i32
    return %c0_i32, %c0_i32_0 : i32, i32
  }
  func.func @transform_7(%arg0: i32) -> (i32, i32) {
    %c0_i32 = arith.constant 0 : i32
    %c0_i32_0 = arith.constant 0 : i32
    %c0_i32_1 = arith.constant 0 : i32
    return %c0_i32, %c0_i32_0 : i32, i32
  }
  func.func @transform_8(%arg0: i32) -> (i32, i32) {
    %c0_i32 = arith.constant 0 : i32
    %c0_i32_0 = arith.constant 0 : i32
    %c0_i32_1 = arith.constant 0 : i32
    return %c0_i32, %c0_i32_0 : i32, i32
  }
  func.func @transform_9(%arg0: i32) -> (i32, i32) {
    %c0_i32 = arith.constant 0 : i32
    %c0_i32_0 = arith.constant 0 : i32
    return %c0_i32, %arg0 : i32, i32
  }
}

</mosaic_0001>

<bundles_post_ra>
// kernel: estimation_decoder_fc.1
= control target key start
LH: loop header
LB: loop body
LE: loop exit
PB: predicated region body
PF: predicated region fallthrough
CT: control target
= control target key end

     0   :  { %vm154_vm0 = vcmask 1043456   ;;  %v669_v0 = vmov 0   ;;  %vm141_vm1 = vcmask 64512   ;;  %vm299_vm10 = vcmask 523264   ;;  %s841_s2 = inlined_call_operand.vmem [shape: f32[64,1], index: 2, kind: input, shape index: {}]   ;;  %s842_s0 = inlined_call_operand.vmem [shape: bf16[8,128], index: 0, kind: input, shape index: {}]   ;;  %s843_s1 = inlined_call_operand.vmem [shape: bf16[64,8], index: 1, kind: input, shape index: {}]   ;;  %s844_s4 = inlined_call_operand.vmem [shape: f32[64,1], index: 4, kind: input, shape index: {}]   ;;  %s845_s8 = inlined_call_operand.<no memory space> [shape: f32[1,1], index: 8, kind: input, shape index: {}]   ;;  %s846_s6 = inlined_call_operand.vmem [shape: f32[32,1], index: 6, kind: input, shape index: {}]   ;;  %s847_s7 = inlined_call_operand.vmem [shape: f32[32,1], index: 7, kind: input, shape index: {}]   ;;  %s848_s3 = inlined_call_operand.vmem [shape: bf16[64,64], index: 3, kind: input, shape index: {}]   ;;  %s849_s5 = inlined_call_operand.vmem [shape: bf16[32,64], index: 5, kind: input, shape index: {}]   ;;  %s850_s9 = inlined_call_operand.vmem [shape: f32[1,128], index: 9, kind: output, shape index: {}]  }
   0x1   :  { %623 = vset.pattern.permute.xlu1 %v669_v0  ;;  %622 = vset.pattern.permute.xlu0 %v669_v0  ;;  %v65_v1 = vld [vmem:[%s841_s2 + $0x30] sm:$0xff]  ;;  %v63_v2 = vld [vmem:[%s841_s2 + $0x20] sm:$0xff]  ;;  %v609_v6 = vld [vmem:[%s843_s1 + $0x18] sm:$0xff]  ;;  %v14_v17 = vstv %s845_s8 }
   0x2   :  { %v80_v3 = vld [vmem:[%s842_s0] sm:$0xf]  ;;  %113 = vperm.xlu0 %622, %v65_v1   ;;  %103 = vperm.xlu1 %623, %v63_v2   ;;  %v61_v7 = vld [vmem:[%s841_s2 + $0x10] sm:$0xff]  ;;  %v66_v8 = vld [vmem:[%s841_s2 + $0x38] sm:$0xff]  ;;  %15 = vst [vmem:[#allocation2] sm:$0x1] %v14_v17 }
   0x3   :  { %v156_v4 = vsel %vm154_vm0, %v80_v3, 0  ;;  %v606_v5 = vld [vmem:[%s843_s1] sm:$0xff]  ;;  %624 = vset.pattern.permute.xlu2 %v669_v0  ;;  %v64_v9 = vld [vmem:[%s841_s2 + $0x28] sm:$0xff]  ;;  %v62_v10 = vld [vmem:[%s841_s2 + $0x18] sm:$0xff] }
   0x4   :  { %165 = vmatpush.bf16.msra.mxu0 %v156_v4  ;;  %616 = vmatpush.bf16.msra.mxu1 %v156_v4  ;;  %v60_v11 = vld [vmem:[%s841_s2 + $0x8] sm:$0xff]  ;;  %v59_v12 = vld [vmem:[%s841_s2] sm:$0xff]  ;;  %v73_v14 = vld [vmem:[%s844_s4 + $0x30] sm:$0xff] }
   0x5   :  { %93 = vperm.xlu2 %624, %v61_v7   ;;  %v607_v13 = vld [vmem:[%s843_s1 + $0x8] sm:$0xff]  ;;  %v71_v15 = vld [vmem:[%s844_s4 + $0x20] sm:$0xff]  ;;  %v74_v16 = vld [vmem:[%s844_s4 + $0x38] sm:$0xff] }
   0x6   :  { %v72_v18 = vld [vmem:[%s844_s4 + $0x28] sm:$0xff]  ;;  %v70_v19 = vld [vmem:[%s844_s4 + $0x18] sm:$0xff]  ;;  %v69_v20 = vld [vmem:[%s844_s4 + $0x10] sm:$0xff] }
   0x7   :  { %552 = vmatmul.msk.bf16.vlgmr.msra.gmra.mxu0 %vm141_vm1, %v606_v5  ;;  %555 = vmatmul.msk.bf16.vlgmr.msra.gmra.mxu1 %vm141_vm1, %v609_v6  ;;  %v608_v21 = vld [vmem:[%s843_s1 + $0x10] sm:$0xff]  ;;  %v67_v22 = vld [vmem:[%s844_s4] sm:$0xff]  ;;  %v68_v24 = vld [vmem:[%s844_s4 + $0x8] sm:$0xff] }
   0x8   :  { %v75_v23 = vld [vmem:[%s846_s6] sm:$0xff]  ;;  %v76_v25 = vld [vmem:[%s846_s6 + $0x8] sm:$0xff]  ;;  %v78_v26 = vld [vmem:[%s846_s6 + $0x18] sm:$0xff] }
   0x9   :  { %v77_v27 = vld [vmem:[%s846_s6 + $0x10] sm:$0xff]  ;;  %v55_v28 = vld [vmem:[%s847_s7] sm:$0xff]  ;;  %v56_v30 = vld [vmem:[%s847_s7 + $0x8] sm:$0xff] }
   0xa   :  { %118 = vperm.xlu0 %622, %v66_v8   ;;  %108 = vperm.xlu1 %623, %v64_v9   ;;  %v57_v29 = vld [vmem:[%s847_s7 + $0x10] sm:$0xff]  ;;  %v58_v31 = vld [vmem:[%s847_s7 + $0x18] sm:$0xff]  ;;  %v79_v32 = vld [vmem:[#allocation2] sm:$0x1] }
   0xd   :  { %98 = vperm.xlu2 %624, %v62_v10  }
  0x12   :  { %88 = vperm.xlu1 %623, %v60_v11   ;;  %83 = vperm.xlu0 %622, %v59_v12  }
  0x15   :  { %271 = vperm.xlu2 %624, %v73_v14  }
  0x17   :  { %553 = vmatmul.msk.bf16.gmra.mxu0 %vm141_vm1, %v607_v13 }
  0x1a   :  { %261 = vperm.xlu1 %623, %v71_v15   ;;  %276 = vperm.xlu0 %622, %v74_v16  }
  0x1d   :  { %266 = vperm.xlu2 %624, %v72_v18  }
  0x22   :  { %256 = vperm.xlu1 %623, %v70_v19   ;;  %251 = vperm.xlu0 %622, %v69_v20  }
  0x25   :  { %241 = vperm.xlu2 %624, %v67_v22  }
  0x27   :  { %554 = vmatmul.msk.bf16.gmra.mxu0 %vm141_vm1, %v608_v21 }
  0x2a   :  { %395 = vperm.xlu1 %623, %v75_v23   ;;  %246 = vperm.xlu0 %622, %v68_v24  }
  0x2d   :  { %400 = vperm.xlu2 %624, %v76_v25  }
  0x32   :  { %410 = vperm.xlu1 %623, %v78_v26   ;;  %405 = vperm.xlu0 %622, %v77_v27  }
  0x35   :  { %474 = vperm.xlu2 %624, %v55_v28  }
  0x3a   :  { %484 = vperm.xlu1 %623, %v57_v29   ;;  %479 = vperm.xlu0 %622, %v56_v30  }
  0x3d   :  { %489 = vperm.xlu2 %624, %v58_v31  }
  0x42   :  { %507 = vperm.xlu0 %622, %v79_v32  }
  0x5f   :  { %v94_v50 = vpop.permute.xlu2 %93 }
  0x67   :  { %v99_v57 = vpop.permute.xlu2 %98 }
  0x74   :  { %v114_v33 = vpop.permute.xlu0 %113  ;;  %v104_v46 = vpop.permute.xlu1 %103 }
  0x7c   :  { %v119_v39 = vpop.permute.xlu0 %118  ;;  %v109_v55 = vpop.permute.xlu1 %108 }
  0x84   :  { %v167_v34 = vpop.f32.mrf.mxu0  ;;  %v182_v35 = vpop.f32.mrf.mxu1 }
  0x85   :  { %v183_v36 = vadd.f32 %v182_v35, %v114_v33  ;;  %v89_v63 = vpop.permute.xlu1 %88  ;;  %v84_v0 = vpop.permute.xlu0 %83 }
  0x86   :  { %v168_v4 = vadd.f32 %v167_v34, %v84_v0 }
  0x87   :  { %v201_v37 = vmin.f32 %v183_v36, 0.0  ;;  %vm193_vm2 = vcmp.gt.f32.partialorder %v183_v36, 0.0 }
  0x88   :  { %v195_v11 = vmin.f32 %v168_v4, 0.0  ;;  %vm187_vm9 = vcmp.gt.f32.partialorder %v168_v4, 0.0 }
  0x89   :  { %v215_v38 = vmul.f32 1.442695, %v201_v37  ;;  %v610_v37 = vld [vmem:[%s848_s3] sm:$0xff] }
  0x8a   :  { %v203_v15 = vmul.f32 1.442695, %v195_v11 }
  0x8b   :  { %625 = vpow2.f32 %v215_v38  ;;  %v611_v38 = vld [vmem:[%s848_s3 + $0x8] sm:$0xff] }
  0x8c   :  { %v169_v40 = vpop.f32.mrf.mxu0  ;;  %v184_v41 = vpop.f32.mrf.mxu1 }
  0x8d   :  { %v185_v42 = vadd.f32 %v184_v41, %v119_v39  ;;  %v170_v1 = vadd.f32 %v169_v40, %v89_v63  ;;  %v612_v39 = vld [vmem:[%s848_s3 + $0x10] sm:$0xff]  ;;  %v613_v40 = vld [vmem:[%s848_s3 + $0x18] sm:$0xff] }
  0x8f   :  { %v202_v43 = vmin.f32 %v185_v42, 0.0  ;;  %vm194_vm3 = vcmp.gt.f32.partialorder %v185_v42, 0.0  ;;  %v196_v7 = vmin.f32 %v170_v1, 0.0  ;;  %vm188_vm8 = vcmp.gt.f32.partialorder %v170_v1, 0.0 }
  0x91   :  { %v217_v44 = vmul.f32 1.442695, %v202_v43  ;;  %v626_v45 = vpop.eup %625  ;;  %v205_v13 = vmul.f32 1.442695, %v196_v7 }
  0x92   :  { %v562_v48 = vadd.f32 -1.0, %v626_v45  ;;  %v272_v45 = vpop.permute.xlu2 %271 }
  0x93   :  { %627 = vpow2.f32 %v217_v44  ;;  %v277_v44 = vpop.permute.xlu0 %276 }
  0x94   :  { %v172_v47 = vpop.f32.mrf.mxu0  ;;  %v233_v52 = vsel %vm193_vm2, %v183_v36, %v562_v48 }
  0x95   :  { %v173_v61 = vadd.f32 %v172_v47, %v94_v50  ;;  %v262_v47 = vpop.permute.xlu1 %261 }
  0x97   :  { %v197_v3 = vmin.f32 %v173_v61, 0.0  ;;  %vm189_vm7 = vcmp.gt.f32.partialorder %v173_v61, 0.0 }
  0x99   :  { %v628_v49 = vpop.eup %627  ;;  %v207_v10 = vmul.f32 1.442695, %v197_v3 }
  0x9a   :  { %v563_v51 = vadd.f32 -1.0, %v628_v49  ;;  %v267_v50 = vpop.permute.xlu2 %266 }
  0x9b   :  { %v252_v49 = vpop.permute.xlu0 %251 }
  0x9c   :  { %v174_v53 = vpop.f32.mrf.mxu0  ;;  %v234_v54 = vsel %vm194_vm3, %v185_v42, %v563_v51 }
  0x9d   :  { %v238_v56 = vpack.c.bf16 %v234_v54, %v233_v52  ;;  %v175_v59 = vadd.f32 %v174_v53, %v99_v57 }
  0x9f   :  { %316 = vmatpush.bf16.msrb.mxu1 %v238_v56  ;;  %617 = vmatpush.bf16.msra.mxu3 %v238_v56  ;;  %v198_v2 = vmin.f32 %v175_v59, 0.0  ;;  %vm190_vm6 = vcmp.gt.f32.partialorder %v175_v59, 0.0  ;;  %v257_v56 = vpop.permute.xlu1 %256 }
  0xa1   :  { %v209_v8 = vmul.f32 1.442695, %v198_v2 }
  0xa3   :  { %v247_v63 = vpop.permute.xlu0 %246 }
  0xa4   :  { %v177_v58 = vpop.f32.mrf.mxu0 }
  0xa5   :  { %v178_v60 = vadd.f32 %v177_v58, %v104_v46 }
  0xa7   :  { %v199_v62 = vmin.f32 %v178_v60, 0.0  ;;  %vm191_vm4 = vcmp.gt.f32.partialorder %v178_v60, 0.0 }
  0xa9   :  { %v211_v5 = vmul.f32 1.442695, %v199_v62 }
  0xab   :  { %629 = vpow2.f32 %v211_v5  ;;  %v242_v5 = vpop.permute.xlu2 %241 }
  0xac   :  { %v179_v6 = vpop.f32.mrf.mxu0  ;;  %631 = vpow2.f32 %v209_v8 }
  0xad   :  { %v180_v9 = vadd.f32 %v179_v6, %v109_v55  ;;  %633 = vpow2.f32 %v207_v10 }
  0xaf   :  { %v200_v12 = vmin.f32 %v180_v9, 0.0  ;;  %vm192_vm5 = vcmp.gt.f32.partialorder %v180_v9, 0.0 }
  0xb1   :  { %v213_v14 = vmul.f32 1.442695, %v200_v12  ;;  %v630_v16 = vpop.eup %629 }
  0xb2   :  { %v632_v17 = vpop.eup %631  ;;  %v560_v19 = vadd.f32 -1.0, %v630_v16 }
  0xb3   :  { %635 = vpow2.f32 %v213_v14  ;;  %v634_v18 = vpop.eup %633  ;;  %v559_v22 = vadd.f32 -1.0, %v632_v17 }
  0xb4   :  { %637 = vpow2.f32 %v205_v13  ;;  %v231_v24 = vsel %vm191_vm4, %v178_v60, %v560_v19  ;;  %v558_v26 = vadd.f32 -1.0, %v634_v18 }
  0xb5   :  { %639 = vpow2.f32 %v203_v15  ;;  %v230_v29 = vsel %vm190_vm6, %v175_v59, %v559_v22 }
  0xb6   :  { %v229_v31 = vsel %vm189_vm7, %v173_v61, %v558_v26 }
  0xb7   :  { %v236_v33 = vpack.c.bf16 %v230_v29, %v229_v31 }
  0xb9   :  { %v636_v20 = vpop.eup %635 }
  0xba   :  { %v561_v21 = vadd.f32 -1.0, %v636_v20  ;;  %v638_v23 = vpop.eup %637 }
  0xbb   :  { %v640_v27 = vpop.eup %639  ;;  %v557_v30 = vadd.f32 -1.0, %v638_v23 }
  0xbc   :  { %v232_v25 = vsel %vm192_vm5, %v180_v9, %v561_v21  ;;  %v556_v32 = vadd.f32 -1.0, %v640_v27 }
  0xbd   :  { %v237_v28 = vpack.c.bf16 %v232_v25, %v231_v24  ;;  %v228_v34 = vsel %vm188_vm8, %v170_v1, %v557_v30 }
  0xbe   :  { %v227_v35 = vsel %vm187_vm9, %v168_v4, %v556_v32 }
  0xbf   :  { %317 = vmatpush.bf16.msrb.mxu1 %v237_v28  ;;  %618 = vmatpush.bf16.msra.mxu3 %v237_v28  ;;  %v235_v36 = vpack.c.bf16 %v228_v34, %v227_v35 }
  0xc3   :  { %318 = vmatpush.bf16.msrb.mxu1 %v236_v33  ;;  %619 = vmatpush.bf16.msra.mxu3 %v236_v33 }
  0xc7   :  { %319 = vmatpush.bf16.msrb.mxu1 %v235_v36  ;;  %620 = vmatpush.bf16.msra.mxu3 %v235_v36 }
  0xca   :  { %580 = vmatmul.msk.bf16.vlgmr.msrb.gmra.mxu1 %vm299_vm10, %v610_v37  ;;  %581 = vmatmul.msk.bf16.vlgmr.msra.gmra.mxu3 %vm299_vm10, %v611_v38 }
  0xda   :  { %582 = vmatmul.msk.bf16.gmra.mxu3 %vm299_vm10, %v612_v39 }
  0xea   :  { %583 = vmatmul.msk.bf16.gmra.mxu3 %vm299_vm10, %v613_v40 }
 0x147   :  { %v321_v48 = vpop.f32.mrf.mxu1 }
 0x148   :  { %v322_v7 = vadd.f32 %v321_v48, %v242_v5  ;;  %v401_v48 = vpop.permute.xlu2 %400 }
 0x14a   :  { %v349_v13 = vmin.f32 %v322_v7, 0.0  ;;  %vm341_vm2 = vcmp.gt.f32.partialorder %v322_v7, 0.0 }
 0x14c   :  { %v357_v18 = vmul.f32 1.442695, %v349_v13 }
 0x14d   :  { %v326_v41 = vpop.f32.mrf.mxu3 }
 0x14e   :  { %v327_v61 = vadd.f32 %v326_v41, %v252_v49  ;;  %v396_v49 = vpop.permute.xlu1 %395 }
 0x14f   :  { %v323_v59 = vpop.f32.mrf.mxu1 }
 0x150   :  { %v324_v1 = vadd.f32 %v323_v59, %v247_v63  ;;  %v351_v8 = vmin.f32 %v327_v61, 0.0  ;;  %vm343_vm0 = vcmp.gt.f32.partialorder %v327_v61, 0.0 }
 0x152   :  { %v350_v10 = vmin.f32 %v324_v1, 0.0  ;;  %v361_v14 = vmul.f32 1.442695, %v351_v8  ;;  %vm342_vm1 = vcmp.gt.f32.partialorder %v324_v1, 0.0 }
 0x154   :  { %v359_v16 = vmul.f32 1.442695, %v350_v10 }
 0x155   :  { %v328_v42 = vpop.f32.mrf.mxu3 }
 0x156   :  { %v329_v57 = vadd.f32 %v328_v42, %v257_v56  ;;  %v406_v56 = vpop.permute.xlu0 %405 }
 0x158   :  { %v352_v2 = vmin.f32 %v329_v57, 0.0  ;;  %vm344_vm15 = vcmp.gt.f32.partialorder %v329_v57, 0.0 }
 0x15a   :  { %v363_v11 = vmul.f32 1.442695, %v352_v2 }
 0x15d   :  { %v331_v43 = vpop.f32.mrf.mxu3 }
 0x15e   :  { %v332_v54 = vadd.f32 %v331_v43, %v262_v47 }
 0x160   :  { %v353_v60 = vmin.f32 %v332_v54, 0.0  ;;  %vm345_vm14 = vcmp.gt.f32.partialorder %v332_v54, 0.0 }
 0x162   :  { %v365_v6 = vmul.f32 1.442695, %v353_v60 }
 0x165   :  { %v333_v46 = vpop.f32.mrf.mxu3 }
 0x166   :  { %v334_v52 = vadd.f32 %v333_v46, %v267_v50  ;;  %v615_v46 = vld [vmem:[%s849_s5 + $0x8] sm:$0xff] }
 0x168   :  { %v354_v58 = vmin.f32 %v334_v52, 0.0  ;;  %vm346_vm13 = vcmp.gt.f32.partialorder %v334_v52, 0.0 }
 0x16a   :  { %v367_v3 = vmul.f32 1.442695, %v354_v58 }
 0x16d   :  { %v336_v51 = vpop.f32.mrf.mxu3 }
 0x16e   :  { %v337_v53 = vadd.f32 %v336_v51, %v272_v45  ;;  %v614_v45 = vld [vmem:[%s849_s5] sm:$0xff] }
 0x170   :  { %v355_v55 = vmin.f32 %v337_v53, 0.0  ;;  %vm347_vm11 = vcmp.gt.f32.partialorder %v337_v53, 0.0 }
 0x172   :  { %v369_v62 = vmul.f32 1.442695, %v355_v55 }
 0x174   :  { %641 = vpow2.f32 %v369_v62  ;;  %v411_v62 = vpop.permute.xlu1 %410 }
 0x175   :  { %v338_v0 = vpop.f32.mrf.mxu3  ;;  %643 = vpow2.f32 %v367_v3 }
 0x176   :  { %v339_v4 = vadd.f32 %v338_v0, %v277_v44  ;;  %645 = vpow2.f32 %v365_v6 }
 0x178   :  { %v356_v9 = vmin.f32 %v339_v4, 0.0  ;;  %vm348_vm12 = vcmp.gt.f32.partialorder %v339_v4, 0.0 }
 0x17a   :  { %v371_v12 = vmul.f32 1.442695, %v356_v9  ;;  %v642_v15 = vpop.eup %641 }
 0x17b   :  { %v644_v17 = vpop.eup %643  ;;  %v590_v20 = vadd.f32 -1.0, %v642_v15 }
 0x17c   :  { %647 = vpow2.f32 %v371_v12  ;;  %v646_v19 = vpop.eup %645  ;;  %v589_v23 = vadd.f32 -1.0, %v644_v17  ;;  %v485_v15 = vpop.permute.xlu1 %484 }
 0x17d   :  { %649 = vpow2.f32 %v363_v11  ;;  %v387_v25 = vsel %vm347_vm11, %v337_v53, %v590_v20  ;;  %v588_v27 = vadd.f32 -1.0, %v646_v19  ;;  %v480_v11 = vpop.permute.xlu0 %479 }
 0x17e   :  { %651 = vpow2.f32 %v361_v14  ;;  %v386_v30 = vsel %vm346_vm13, %v334_v52, %v589_v23 }
 0x17f   :  { %653 = vpow2.f32 %v359_v16  ;;  %v385_v33 = vsel %vm345_vm14, %v332_v54, %v588_v27 }
 0x180   :  { %655 = vpow2.f32 %v357_v18  ;;  %v391_v36 = vpack.c.bf16 %v386_v30, %v385_v33 }
 0x182   :  { %v648_v21 = vpop.eup %647 }
 0x183   :  { %v591_v22 = vadd.f32 -1.0, %v648_v21  ;;  %v650_v24 = vpop.eup %649 }
 0x184   :  { %v652_v28 = vpop.eup %651  ;;  %v587_v31 = vadd.f32 -1.0, %v650_v24 }
 0x185   :  { %v388_v26 = vsel %vm348_vm12, %v339_v4, %v591_v22  ;;  %v654_v32 = vpop.eup %653  ;;  %v586_v34 = vadd.f32 -1.0, %v652_v28  ;;  %v508_v30 = vpop.permute.xlu0 %507 }
 0x186   :  { %v392_v29 = vpack.c.bf16 %v388_v26, %v387_v25  ;;  %v656_v35 = vpop.eup %655  ;;  %v384_v37 = vsel %vm344_vm15, %v329_v57, %v587_v31  ;;  %v585_v38 = vadd.f32 -1.0, %v654_v32  ;;  %v510_v32 = vperm.slane %v508_v30, 0 }
 0x187   :  { %v383_v39 = vsel %vm343_vm0, %v327_v61, %v586_v34  ;;  %v584_v40 = vadd.f32 -1.0, %v656_v35 }
 0x188   :  { %433 = vmatpush.bf16.msra.mxu2 %v392_v29  ;;  %v390_v41 = vpack.c.bf16 %v384_v37, %v383_v39  ;;  %v382_v42 = vsel %vm342_vm1, %v324_v1, %v585_v38 }
 0x189   :  { %v381_v43 = vsel %vm341_vm2, %v322_v7, %v584_v40  ;;  %v475_v7 = vpop.permute.xlu2 %474 }
 0x18a   :  { %v389_v44 = vpack.c.bf16 %v382_v42, %v381_v43 }
 0x18c   :  { %434 = vmatpush.bf16.msra.mxu2 %v391_v36 }
 0x190   :  { %435 = vmatpush.bf16.msra.mxu2 %v390_v41 }
 0x191   :  { %v490_v21 = vpop.permute.xlu2 %489 }
 0x194   :  { %436 = vmatpush.bf16.msra.mxu2 %v389_v44 }
 0x197   :  { %600 = vmatmul.msk.bf16.vlgmr.msra.gmra.mxu2 %vm299_vm10, %v614_v45 }
 0x1a7   :  { %601 = vmatmul.msk.bf16.gmra.mxu2 %vm299_vm10, %v615_v46 }
 0x21a   :  { %v438_v47 = vpop.f32.mrf.mxu2 }
 0x21b   :  { %v439_v51 = vadd.f32 %v438_v47, %v396_v49 }
 0x21d   :  { %v452_v54 = vmin.f32 %v439_v51, 0.0  ;;  %vm448_vm4 = vcmp.gt.f32.partialorder %v439_v51, 0.0 }
 0x21f   :  { %v456_v58 = vmul.f32 1.442695, %v452_v54 }
 0x222   :  { %v440_v50 = vpop.f32.mrf.mxu2 }
 0x223   :  { %v441_v52 = vadd.f32 %v440_v50, %v401_v48 }
 0x225   :  { %v453_v53 = vmin.f32 %v441_v52, 0.0  ;;  %vm449_vm3 = vcmp.gt.f32.partialorder %v441_v52, 0.0 }
 0x227   :  { %v458_v55 = vmul.f32 1.442695, %v453_v53 }
 0x229   :  { %657 = vpow2.f32 %v458_v55 }
 0x22a   :  { %v443_v57 = vpop.f32.mrf.mxu2  ;;  %659 = vpow2.f32 %v456_v58 }
 0x22b   :  { %v444_v59 = vadd.f32 %v443_v57, %v406_v56 }
 0x22d   :  { %v454_v60 = vmin.f32 %v444_v59, 0.0  ;;  %vm450_vm5 = vcmp.gt.f32.partialorder %v444_v59, 0.0 }
 0x22f   :  { %v460_v61 = vmul.f32 1.442695, %v454_v60  ;;  %v658_v0 = vpop.eup %657 }
 0x230   :  { %v660_v2 = vpop.eup %659  ;;  %v603_v4 = vadd.f32 -1.0, %v658_v0 }
 0x231   :  { %661 = vpow2.f32 %v460_v61  ;;  %v602_v8 = vadd.f32 -1.0, %v660_v2 }
 0x232   :  { %v445_v63 = vpop.f32.mrf.mxu2  ;;  %v469_v10 = vsel %vm449_vm3, %v441_v52, %v603_v4 }
 0x233   :  { %v446_v1 = vadd.f32 %v445_v63, %v411_v62  ;;  %v468_v12 = vsel %vm448_vm4, %v439_v51, %v602_v8  ;;  %v493_v14 = vmul.f32 %v480_v11, %v469_v10 }
 0x234   :  { %v492_v17 = vmul.f32 %v475_v7, %v468_v12 }
 0x235   :  { %v455_v3 = vmin.f32 %v446_v1, 0.0  ;;  %vm451_vm6 = vcmp.gt.f32.partialorder %v446_v1, 0.0 }
 0x236   :  { %v496_v20 = vadd.f32 %v493_v14, %v492_v17 }
 0x237   :  { %v662_v5 = vpop.eup %661  ;;  %v462_v6 = vmul.f32 1.442695, %v455_v3 }
 0x238   :  { %v604_v9 = vadd.f32 -1.0, %v662_v5 }
 0x239   :  { %663 = vpow2.f32 %v462_v6 }
 0x23a   :  { %v470_v13 = vsel %vm450_vm5, %v444_v59, %v604_v9 }
 0x23b   :  { %v494_v18 = vmul.f32 %v485_v15, %v470_v13 }
 0x23d   :  { %v497_v23 = vadd.f32 %v496_v20, %v494_v18 }
 0x23f   :  { %v664_v16 = vpop.eup %663 }
 0x240   :  { %v605_v19 = vadd.f32 -1.0, %v664_v16 }
 0x242   :  { %v471_v22 = vsel %vm451_vm6, %v446_v1, %v605_v19 }
 0x243   :  { %v495_v24 = vmul.f32 %v490_v21, %v471_v22 }
 0x245   :  { %v498_v25 = vadd.f32 %v497_v23, %v495_v24 }
 0x247   :  { %v499_v26 = vrot.slane %v498_v25, 4 }
 0x249   :  { %v500_v27 = vadd.f32 %v499_v26, %v498_v25 }
 0x24b   :  { %v501_v28 = vrot.slane %v500_v27, 2 }
 0x24d   :  { %v502_v29 = vadd.f32 %v501_v28, %v500_v27 }
 0x24f   :  { %v503_v31 = vrot.slane %v502_v29, 1 }
 0x251   :  { %v504_v33 = vadd.f32 %v503_v31, %v502_v29 }
 0x253   :  { %v511_v34 = vadd.f32 %v510_v32, %v504_v33 }
 0x255   :  { %v512_v35 = vsub.f32 0.0, %v511_v34 }
 0x257   :  { %v513_v36 = vmul.f32 1.442695, %v512_v35 }
 0x259   :  { %665 = vpow2.f32 %v513_v36 }
 0x25f   :  { %v666_v37 = vpop.eup %665 }
 0x260   :  { %v515_v38 = vadd.f32 1.0, %v666_v37 }
 0x262   :  { %667 = vrcp.f32 %v515_v38  ;;  %v527_v42 = vand.u32 2147483648, %v515_v38  ;;  %v525_v44 = vand.u32 2147483647, %v515_v38  ;;  %vm521_vm8 = vweird.f32 %v515_v38 }
 0x264   :  { %v528_v46 = vor.u32 1.1754944e-38, %v527_v42  ;;  %vm526_vm10 = vcmp.eq.f32.partialorder %v525_v44, 8.507059e+37 }
 0x268   :  { %v668_v39 = vpop.eup %667 }
 0x269   :  { %v517_v40 = vmul.f32 %v668_v39, %v515_v38  ;;  %vm522_vm7 = vweird.f32 %v668_v39 }
 0x26a   :  { %vm523_vm9 = vmor %vm521_vm8, %vm522_vm7 }
 0x26b   :  { %v518_v41 = vsub.f32 1.0, %v517_v40 }
 0x26d   :  { %v519_v43 = vmul.f32 %v668_v39, %v518_v41 }
 0x26f   :  { %v520_v45 = vadd.f32 %v668_v39, %v519_v43 }
 0x271   :  { %v524_v47 = vsel %vm523_vm9, %v668_v39, %v520_v45 }
 0x272   :  { %v529_v48 = vsel %vm526_vm10, %v528_v46, %v524_v47 }
 0x273   :  { %531 = vst [vmem:[%s850_s9] sm:$0x1] %v529_v48 }

</bundles_post_ra>
